<compile_context>
chip_gen: v7x
topology: tpu7x:2x2x1
jax: 0.10.0
libtpu: 0.0.40
codegen_flags: <defaults>
</compile_context>

<pallas_src>
import jax
import jax.numpy as jnp
from jax.experimental import pallas as pl
from jax.experimental.pallas import tpu as pltpu


def _round_up(a: int, m: int) -> int:
    return (a + m - 1) // m * m


def _linear_kernel(params_ref, x_ref, o_ref):
    # params_ref: (3,) f32 in SMEM  -> [w0, w1, b]
    # x_ref:      (2, TILE_N) f32 in VMEM  (features on sublanes, batch on lanes)
    # o_ref:      (1, TILE_N) f32 in VMEM  (lane-dense output)
    w0 = params_ref[0]
    w1 = params_ref[1]
    b = params_ref[2]
    x0 = x_ref[0:1, :]                      # (1, TILE_N)
    x1 = x_ref[1:2, :]                      # (1, TILE_N)
    o_ref[...] = x0 * w0 + x1 * w1 + b      # pure VPU, no MXU / XLU


def moneyball_linear(x, weight, bias, *, tile_n: int = 2048):
    """Pallas implementation of torch.nn.Linear(2, 1) forward.

    x:      (N, 2) f32
    weight: (1, 2) f32
    bias:   (1,)   f32
    returns (N, 1) f32
    """
    n, in_f = x.shape
    out_f, _ = weight.shape
    assert in_f == 2 and out_f == 1, "Moneyball module is Linear(2, 1)"

    # Scalar params for SMEM: [w0, w1, b].
    params = jnp.concatenate(
        [weight.reshape(-1), bias.reshape(-1)]).astype(jnp.float32)

    # Lane-major layout: batch on the 128-lane axis, padded to the tile size.
    tile_n = max(128, min(tile_n, _round_up(n, 128)))
    n_pad = _round_up(n, tile_n)
    x_t = jnp.zeros((in_f, n_pad), jnp.float32).at[:, :n].set(
        x.T.astype(jnp.float32))

    grid = (n_pad // tile_n,)

    y_t = pl.pallas_call(
        _linear_kernel,
        out_shape=jax.ShapeDtypeStruct((out_f, n_pad), jnp.float32),
        grid_spec=pltpu.PrefetchScalarGridSpec(
            num_scalar_prefetch=0,
            grid=grid,
            in_specs=[
                # (3,) scalars resident in SMEM across the whole grid.
                pl.BlockSpec(memory_space=pltpu.MemorySpace.SMEM),
                # (2, TILE_N) lane-dense batch tile.
                pl.BlockSpec((in_f, tile_n), lambda i: (0, i)),
            ],
            out_specs=pl.BlockSpec((out_f, tile_n), lambda i: (0, i)),
        ),
        compiler_params=pltpu.CompilerParams(
            dimension_semantics=("parallel",)),
    )(params, x_t)

    # Undo the wrapper-side layout plumbing: (1, N_pad) -> (N, 1).
    return y_t[:, :n].T


if __name__ == "__main__":
    key = jax.random.PRNGKey(0)
    k_x, k_w, k_b = jax.random.split(key, 3)

    # Small batch of Moneyball-style (2-feature) inputs.
    N, IN_F, OUT_F = 8, 2, 1
    x = jax.random.normal(k_x, (N, IN_F), dtype=jnp.float32)

    # Deterministic parameter init mirroring nn.Linear(2, 1) default:
    # uniform(-1/sqrt(in_features), 1/sqrt(in_features)).
    bound = 1.0 / jnp.sqrt(jnp.float32(IN_F))
    weight = jax.random.uniform(k_w, (OUT_F, IN_F), jnp.float32, -bound, bound)
    bias = jax.random.uniform(k_b, (OUT_F,), jnp.float32, -bound, bound)

    y = moneyball_linear(x, weight, bias)
    jax.block_until_ready(y)

    # Reference check against plain JAX.
    y_ref = x @ weight.T + bias
    assert y.shape == (N, OUT_F)
    assert jnp.allclose(y, y_ref, atol=1e-5, rtol=1e-5)

    print("KERNEL_OK")
</pallas_src>

<mosaic_0001>
module attributes {stable_mosaic.version = 11 : i64} {
  func.func @_linear_kernel(%arg0: i32, %arg1: memref<3xf32, #tpu.memory_space<smem>>, %arg2: memref<2x128xf32, #tpu.memory_space<vmem>>, %arg3: memref<1x128xf32, #tpu.memory_space<vmem>>) attributes {dimension_semantics = [#tpu.dimension_semantics<parallel>], iteration_bounds = array<i64: 1>, scalar_prefetch = 0 : i64, scratch_operands = 0 : i64, tpu.core_type = #tpu.core_type<tc>, window_params = [{transform_indices = @transform_0, window_bounds = array<i64: 3>}, {transform_indices = @transform_1, window_bounds = array<i64: 2, 128>}, {transform_indices = @transform_2, window_bounds = array<i64: 1, 128>}]} {
    %c0 = arith.constant 0 : index
    %0 = memref.load %arg1[%c0] : memref<3xf32, #tpu.memory_space<smem>>
    %c1 = arith.constant 1 : index
    %1 = memref.load %arg1[%c1] : memref<3xf32, #tpu.memory_space<smem>>
    %c2 = arith.constant 2 : index
    %2 = memref.load %arg1[%c2] : memref<3xf32, #tpu.memory_space<smem>>
    %c0_0 = arith.constant 0 : index
    %c0_1 = arith.constant 0 : index
    %3 = vector.load %arg2[%c0_0, %c0_1] : memref<2x128xf32, #tpu.memory_space<vmem>>, vector<1x128xf32>
    %c1_2 = arith.constant 1 : index
    %c0_3 = arith.constant 0 : index
    %4 = vector.load %arg2[%c1_2, %c0_3] : memref<2x128xf32, #tpu.memory_space<vmem>>, vector<1x128xf32>
    %5 = vector.broadcast %0 : f32 to vector<1x128xf32>
    %6 = arith.mulf %3, %5 : vector<1x128xf32>
    %7 = vector.broadcast %1 : f32 to vector<1x128xf32>
    %8 = arith.mulf %4, %7 : vector<1x128xf32>
    %9 = arith.addf %6, %8 : vector<1x128xf32>
    %10 = vector.broadcast %2 : f32 to vector<1x128xf32>
    %11 = arith.addf %9, %10 : vector<1x128xf32>
    %c0_4 = arith.constant 0 : index
    %c0_5 = arith.constant 0 : index
    %12 = vector.load %arg3[%c0_4, %c0_5] : memref<1x128xf32, #tpu.memory_space<vmem>>, vector<1x128xf32>
    tpu.vector_store %arg3[%c0_4, %c0_5], %11 {strides = array<i32>} : memref<1x128xf32, #tpu.memory_space<vmem>>, vector<1x128xf32>,
    return
  }
  func.func @transform_0(%arg0: i32) -> i32 {
    %c0_i32 = arith.constant 0 : i32
    %c0_i32_0 = arith.constant 0 : i32
    return %c0_i32 : i32
  }
  func.func @transform_1(%arg0: i32) -> (i32, i32) {
    %c0_i32 = arith.constant 0 : i32
    %c0_i32_0 = arith.constant 0 : i32
    return %c0_i32, %arg0 : i32, i32
  }
  func.func @transform_2(%arg0: i32) -> (i32, i32) {
    %c0_i32 = arith.constant 0 : i32
    %c0_i32_0 = arith.constant 0 : i32
    return %c0_i32, %arg0 : i32, i32
  }
}

</mosaic_0001>

<bundles_post_ra>
// kernel: tpu_custom_call.1
= control target key start
LH: loop header
LB: loop body
LE: loop exit
PB: predicated region body
PF: predicated region fallthrough
CT: control target
= control target key end

     0   :  { %7 = vsyncpa [#allocation4], 0  ;;  %s138_s0 = inlined_call_operand.hbm [shape: f32[3], index: 0, kind: input, shape index: {}]   ;;  %s139_s1 = inlined_call_operand.vmem [shape: f32[2,128], index: 1, kind: input, shape index: {}]   ;;  %s140_s2 = inlined_call_operand.hbm [shape: f32[1,128], index: 2, kind: output, shape index: {}]  }
   0x1   :  { %8 = vsyncpa [#allocation3], 0  ;;  %s55_s11 = scalar_lea.hbm %s138_s0, 16 }
   0x2   :  { %p56_p0 = scmp.ne.s32.totalorder %s138_s0, %s55_s11  ;;  %p59_p1 = scmp.lt.u32.totalorder %s55_s11, %s138_s0 }
   0x4   :  { %p61_p2 = pnand %p59_p1, %p56_p0 }
   0x6   :  { %64 = shalt.err (!%p61_p2)
}
   0x7   :  { %s91_s16 = smov [#allocation2]  }
   0x8   :  { %16 = dma.hbm_to_smem %s138_s0, 16, %s91_s16, [#allocation4]  }
   0x9   :  { %87 = dma.done.wait [#allocation4], 16  }
   0xa   :  { %88 = vsyncadd [#allocation4], 4294967280 }
   0xb   :  { %22 = sfence }
   0xc   :  { %s23_s19 = sld [smem:[#allocation2]]  ;;  %s51_s20 = sld [smem:[#allocation2 + $0x1]]  ;;  %v26_v0 = vld [vmem:[%s139_s1] sm:$0x1]  ;;  %v27_v1 = vld [vmem:[%s139_s1 + $0x1] sm:$0x1] }
   0xd   :  { %s52_s21 = sld [smem:[#allocation2 + $0x2]]  ;;  %s92_s0 = smov [#allocation5]  }
   0xe   :  { %s42_s26 = sshll.u32 %s92_s0, 4  ;;  %s43_s26 = int_to_ptr.vmem [resolvable:$true] %s42_s26 }
   0xf   :  { %s65_s27 = scalar_lea.vmem %s43_s26, 16  ;;  %s69_s28 = scalar_lea.vmem %s43_s26, 32 }
  0x10   :  { %p66_p3 = scmp.ne.s32.totalorder %s43_s26, %s65_s27  ;;  %p70_p4 = scmp.lt.s32.totalorder %s43_s26, %s43_s26 }
  0x11   :  { %p71_p5 = scmp.lt.s32.totalorder %s69_s28, %s65_s27 }
  0x12   :  { %v28_v2 = vstv %s23_s19  ;;  %v30_v3 = vstv %s51_s20 }
  0x13   :  { %v29_v4 = vmul.f32 %v28_v2, %v26_v0  ;;  %v31_v5 = vmul.f32 %v30_v3, %v27_v1  ;;  %v33_v6 = vstv %s52_s21  ;;  %p72_p6 = por %p71_p5, %p70_p4 }
  0x15   :  { %v32_v7 = vadd.f32 %v31_v5, %v29_v4  ;;  %p73_p7 = pnand %p72_p6, %p66_p3 }
  0x17   :  { %v34_v8 = vadd.f32 %v33_v6, %v32_v7 }
  0x19   :  { %35 = vst [vmem:[#allocation5] sm:$0x1] %v34_v8 }
  0x1a   :  { %76 = shalt.err (!%p73_p7)
}
  0x1b   :  { %s77_s30 = scalar_lea.hbm %s140_s2, 16 }
  0x1c   :  { %p78_p8 = scmp.ne.s32.totalorder %s140_s2, %s77_s30  ;;  %p81_p9 = scmp.lt.u32.totalorder %s77_s30, %s140_s2 }
  0x1e   :  { %p83_p10 = pnand %p81_p9, %p78_p8 }
  0x20   :  { %86 = shalt.err (!%p83_p10)
}
  0x21   :  { %45 = dma.vmem_to_hbm [thread:$0]  %s43_s26, 16, %s140_s2, [#allocation3]  }
  0x22   :  { %89 = dma.done.wait [#allocation3], 16  }
  0x23   :  { %90 = vsyncadd [#allocation3], 4294967280 }
  0x24   :  { %49 = vsyncpa [#allocation3], 1 }
  0x25   :  { %50 = vsyncpa [#allocation4], 1 }

</bundles_post_ra>
